<compile_context>
chip_gen: v7x
topology: tpu7x:2x2x1
jax: 0.10.0
libtpu: 0.0.40
codegen_flags: <defaults>
</compile_context>

<pallas_src>
import numpy as np
import jax
import jax.numpy as jnp
from jax import lax
from jax.experimental import pallas as pl
from jax.experimental.pallas import tpu as pltpu

WIN_LEN, WIN_INC, FFT_LEN = 400, 100, 512


def _round_up(x, m):
    return ((x + m - 1) // m) * m


def _pick_tile(dim, unit, base):
    """Return (tile, padded_dim): single exact tile if small, else `base` tiles."""
    dp = _round_up(dim, unit)
    if dp <= base:
        return dp, dp
    return base, _round_up(dp, base)


# ----------------------------- Pallas kernels ------------------------------

def _matmul_kernel(a_ref, b_ref, o_ref, acc_ref):
    @pl.when(pl.program_id(2) == 0)
    def _():
        acc_ref[...] = jnp.zeros_like(acc_ref)

    acc_ref[...] += jnp.dot(a_ref[...], b_ref[...], preferred_element_type=jnp.float32)

    @pl.when(pl.program_id(2) == pl.num_programs(2) - 1)
    def _():
        o_ref[...] = acc_ref[...]


def pallas_matmul(a, b):
    """a @ b on the MXU: bf16 operands, f32 accumulation, tiled + pipelined."""
    M, K = a.shape
    K2, N = b.shape
    assert K == K2
    tm, Mp = _pick_tile(M, 16, 256)    # tm multiple of 16 for bf16 sublane packing
    tk, Kp = _pick_tile(K, 128, 256)
    tn, Np = _pick_tile(N, 128, 256)
    a_p = jnp.pad(a.astype(jnp.bfloat16), ((0, Mp - M), (0, Kp - K)))
    b_p = jnp.pad(b.astype(jnp.bfloat16), ((0, Kp - K), (0, Np - N)))
    out = pl.pallas_call(
        _matmul_kernel,
        out_shape=jax.ShapeDtypeStruct((Mp, Np), jnp.float32),
        grid=(Mp // tm, Np // tn, Kp // tk),
        in_specs=[pl.BlockSpec((tm, tk), lambda i, j, k: (i, k)),
                  pl.BlockSpec((tk, tn), lambda i, j, k: (k, j))],
        out_specs=pl.BlockSpec((tm, tn), lambda i, j, k: (i, j)),
        scratch_shapes=[pltpu.VMEM((tm, tn), jnp.float32)],
        compiler_params=pltpu.CompilerParams(
            dimension_semantics=("parallel", "parallel", "arbitrary")),
    )(a_p, b_p)
    return out[:M, :N]


def _cbn_prelu_kernel(xr_ref, xi_ref, p_ref, yr_ref, yi_ref):
    # ComplexBatchNorm (training mode, batch statistics) fused with cPReLU.
    # One block = a slab of channels x the full B*F*T axis (stats are per-channel).
    eps = 1e-5
    xr = xr_ref[...]
    xi = xi_ref[...]
    Mr = jnp.mean(xr, axis=1, keepdims=True)
    Mi = jnp.mean(xi, axis=1, keepdims=True)
    xr = xr - Mr
    xi = xi - Mi
    Vrr = jnp.mean(xr * xr, axis=1, keepdims=True) + eps
    Vii = jnp.mean(xi * xi, axis=1, keepdims=True) + eps
    Vri = jnp.mean(xr * xi, axis=1, keepdims=True)
    tau = Vrr + Vii
    delta = Vrr * Vii - Vri * Vri
    s = jnp.sqrt(delta)
    t = jnp.sqrt(tau + 2.0 * s)
    rst = 1.0 / (s * t)
    Urr = (s + Vii) * rst
    Uii = (s + Vrr) * rst
    Uri = -Vri * rst
    Wrr = p_ref[:, 0:1]
    Wri = p_ref[:, 1:2]
    Wii = p_ref[:, 2:3]
    Br = p_ref[:, 3:4]
    Bi = p_ref[:, 4:5]
    Zrr = Wrr * Urr + Wri * Uri
    Zri = Wrr * Uri + Wri * Uii
    Zir = Wri * Urr + Wii * Uri
    Zii = Wri * Uri + Wii * Uii
    yr = Zrr * xr + Zri * xi + Br
    yi = Zir * xr + Zii * xi + Bi
    a = 0.25  # nn.PReLU() default single shared parameter (real and imag branch)
    yr_ref[...] = jnp.where(yr >= 0, yr, a * yr)
    yi_ref[...] = jnp.where(yi >= 0, yi, a * yi)


def _lstm_group_kernel(xg_ref, whh_ref, h_out_ref, h_scr, c_scr):
    # Grouped LSTM step: L=4 weight groups (real/imag LSTM x fwd/bwd direction),
    # 2B rows per group (real-input and imag-input sequences share weights).
    L, H, _ = whh_ref.shape

    @pl.when(pl.program_id(0) == 0)
    def _():
        h_scr[...] = jnp.zeros_like(h_scr)
        c_scr[...] = jnp.zeros_like(c_scr)

    x_all = xg_ref[0]          # (L, 2B, 4H)
    h_prev = h_scr[...]        # (L, 2B, H)
    c_prev = c_scr[...]
    gates = []
    for ld in range(L):
        gates.append(x_all[ld] + jnp.dot(h_prev[ld], whh_ref[ld],
                                         preferred_element_type=jnp.float32))
    g = jnp.stack(gates, axis=0)      # (L, 2B, 4H)

    def sig(v):
        return pl.reciprocal(1.0 + jnp.exp(-v), approx=True)

    i = sig(g[..., 0 * H:1 * H])
    f = sig(g[..., 1 * H:2 * H])
    gg = jnp.tanh(g[..., 2 * H:3 * H])
    o = sig(g[..., 3 * H:4 * H])
    c = f * c_prev + i * gg
    h = o * jnp.tanh(c)
    c_scr[...] = c
    h_scr[...] = h
    h_out_ref[0] = h


def _mask_kernel(mr_ref, mi_ref, sr_ref, si_ref, or_ref, oi_ref):
    mr = mr_ref[...]
    mi = mi_ref[...]
    sr = sr_ref[...]
    si = si_ref[...]
    mm = mr * mr + mi * mi
    ss = sr * sr + si * si
    inv_m = jnp.where(mm > 0, lax.rsqrt(jnp.maximum(mm, 1e-30)), 0.0)
    cos_m = jnp.where(mm > 0, mr * inv_m, 1.0)
    sin_m = mi * inv_m
    mask_mags = mm * inv_m                    # == sqrt(mm) (0 where mm == 0)
    inv_s = jnp.where(ss > 0, lax.rsqrt(jnp.maximum(ss, 1e-30)), 0.0)
    cos_s = jnp.where(ss > 0, sr * inv_s, 1.0)
    sin_s = si * inv_s
    spec_mags = jnp.sqrt(ss + 1e-8)
    est_mags = jnp.tanh(mask_mags) * spec_mags
    cos_e = cos_s * cos_m - sin_s * sin_m
    sin_e = sin_s * cos_m + cos_s * sin_m
    or_ref[...] = est_mags * cos_e
    oi_ref[...] = est_mags * sin_e


# --------------------------- wrappers / glue --------------------------------

def complex_bn_prelu_cn(xr, xi, p):
    """BN+PReLU on (C, N) layout, tiled over channels."""
    C, N = xr.shape
    cb = max(8, C // 8)
    grid = (C // cb,)
    spec = pl.BlockSpec((cb, N), lambda i: (i, 0))
    yr, yi = pl.pallas_call(
        _cbn_prelu_kernel,
        out_shape=(jax.ShapeDtypeStruct((C, N), jnp.float32),
                   jax.ShapeDtypeStruct((C, N), jnp.float32)),
        grid=grid,
        in_specs=[spec, spec, pl.BlockSpec((cb, 5), lambda i: (i, 0))],
        out_specs=(spec, spec),
        compiler_params=pltpu.CompilerParams(dimension_semantics=("parallel",)),
    )(xr, xi, p)
    return yr, yi


def apply_mask(mask_real, mask_imag, spec_real, spec_imag):
    """tanh-mag mask + phase rotation, on a lane-dense flattened slab."""
    shape = mask_real.shape
    n = int(np.prod(shape))
    lanes = 128
    rows = _round_up(n, 8 * lanes) // lanes
    rb = rows if rows <= 256 else 256
    rows_p = _round_up(rows, rb)
    tot = rows_p * lanes

    def prep(x):
        return jnp.pad(x.reshape(-1), (0, tot - n)).reshape(rows_p, lanes)

    ins = [prep(t) for t in (mask_real, mask_imag, spec_real, spec_imag)]
    spec2 = pl.BlockSpec((rb, lanes), lambda i: (i, 0))
    outs = pl.pallas_call(
        _mask_kernel,
        out_shape=(jax.ShapeDtypeStruct((rows_p, lanes), jnp.float32),
                   jax.ShapeDtypeStruct((rows_p, lanes), jnp.float32)),
        grid=(rows_p // rb,),
        in_specs=[spec2] * 4,
        out_specs=(spec2, spec2),
        compiler_params=pltpu.CompilerParams(dimension_semantics=("parallel",)),
    )(*ins)
    real = outs[0].reshape(-1)[:n].reshape(shape)
    imag = outs[1].reshape(-1)[:n].reshape(shape)
    return real, imag


def _im2col(x, kh, kw, sh, sw):
    # x: [B, C, H, W] (already padded) -> ([B*Ho*Wo, C*kh*kw], Ho, Wo)
    B, C, H, W = x.shape
    Ho = (H - kh) // sh + 1
    Wo = (W - kw) // sw + 1
    cols = []
    for ih in range(kh):
        for iw in range(kw):
            cols.append(x[:, :, ih:ih + (Ho - 1) * sh + 1:sh, iw:iw + (Wo - 1) * sw + 1:sw])
    patches = jnp.stack(cols, axis=2)                   # [B, C, kh*kw, Ho, Wo]
    patches = patches.reshape(B, C * kh * kw, Ho, Wo)   # (c, kh, kw) flat, c slowest
    patches = patches.transpose(0, 2, 3, 1).reshape(B * Ho * Wo, C * kh * kw)
    return patches, Ho, Wo


def _complex_weight_matrix(wr, wi):
    # wr, wi: [Co, Ci, kh, kw] forward-conv layout -> [2*Ci*kh*kw, 2*Co]
    Co = wr.shape[0]
    wr_f = wr.reshape(Co, -1).T
    wi_f = wi.reshape(Co, -1).T
    top = jnp.concatenate([wr_f, wi_f], axis=1)
    bot = jnp.concatenate([-wi_f, wr_f], axis=1)
    return jnp.concatenate([top, bot], axis=0)


def _complex_conv_mat(x, layer, transposed):
    """Complex conv / transposed conv as im2col + one Pallas matmul.
       Returns (out_mat [B*Fo*To, 2Co] with bias added, Fo, To)."""
    kh, kw = 5, 2
    xr, xi = jnp.split(x, 2, axis=1)
    if not transposed:
        # ComplexConv2d(kernel=(5,2), stride=(2,1), padding=(2,1), causal)
        pad = ((0, 0), (0, 0), (2, 2), (1, 0))
        xcat = jnp.concatenate([jnp.pad(xr, pad), jnp.pad(xi, pad)], axis=1)
        patches, Fo, To = _im2col(xcat, kh, kw, 2, 1)
    else:
        # ComplexConvTranspose2d(kernel=(5,2), stride=(2,1), padding=(2,0), out_pad=(1,0))
        sh, sw = 2, 1
        pf, pt = kh - 1 - 2, kw - 1 - 0
        opf, opt = 1, 0

        def dilate_pad(z):
            Bz, Cz, Fz, Tz = z.shape
            zd = jnp.zeros((Bz, Cz, (Fz - 1) * sh + 1, (Tz - 1) * sw + 1), z.dtype)
            zd = zd.at[:, :, ::sh, ::sw].set(z)
            return jnp.pad(zd, ((0, 0), (0, 0), (pf, pf + opf), (pt, pt + opt)))

        xcat = jnp.concatenate([dilate_pad(xr), dilate_pad(xi)], axis=1)
        patches, Fo, To = _im2col(xcat, kh, kw, 1, 1)
    out = pallas_matmul(patches, layer['W']) + layer['bias']
    return out, Fo, To


def conv_bn_prelu(x, conv_l, bn_p, transposed):
    """Complex conv (+optional ComplexBatchNorm + cPReLU) returning NCHW."""
    B = x.shape[0]
    out, Fo, To = _complex_conv_mat(x, conv_l, transposed)
    Co2 = out.shape[1]
    Co = Co2 // 2
    if bn_p is None:
        return out.reshape(B, Fo, To, Co2).transpose(0, 3, 1, 2)
    xr = out[:, :Co].T                      # (Co, B*Fo*To)
    xi = out[:, Co:].T
    yr, yi = complex_bn_prelu_cn(xr, xi, bn_p)
    y = jnp.concatenate([yr, yi], axis=0).reshape(Co2, B, Fo, To).transpose(1, 0, 2, 3)
    return y


def complex_cat(tensors, axis):
    reals, imags = [], []
    for t in tensors:
        r, i = jnp.split(t, 2, axis=axis)
        reals.append(r)
        imags.append(i)
    return jnp.concatenate(reals + imags, axis=axis)


def _lstm_grouped(xg, whh):
    # xg: (T, 4, 2B, 4H), whh: (4, H, 4H) -> h: (T, 4, 2B, H)
    T_, L, B2, H4 = xg.shape
    H = whh.shape[1]
    return pl.pallas_call(
        _lstm_group_kernel,
        out_shape=jax.ShapeDtypeStruct((T_, L, B2, H), jnp.float32),
        grid=(T_,),
        in_specs=[pl.BlockSpec((1, L, B2, H4), lambda t: (t, 0, 0, 0)),
                  pl.BlockSpec((L, H, H4), lambda t: (0, 0, 0))],
        out_specs=pl.BlockSpec((1, L, B2, H), lambda t: (t, 0, 0, 0)),
        scratch_shapes=[pltpu.VMEM((L, B2, H), jnp.float32),
                        pltpu.VMEM((L, B2, H), jnp.float32)],
        compiler_params=pltpu.CompilerParams(dimension_semantics=("arbitrary",)),
    )(xg, whh)


def navie_complex_lstm(real, imag, lp):
    """NavieComplexLSTM(bidirectional): all 8 recurrences in one Pallas kernel."""
    T_, B, D = real.shape
    H = lp['H']
    # dedup'd input projection for all (lstm, dir) pairs and both inputs at once
    X = jnp.concatenate([real.reshape(T_ * B, D), imag.reshape(T_ * B, D)], axis=0)
    proj = pallas_matmul(X, lp['w_ih_all'])                    # (2*T*B, 4*4H)
    proj = proj.reshape(2, T_, B, 4, 4 * H) + lp['b_all'][None, None, None]
    # (inp, T, B, ld, 4H) -> (T, ld, 2B, 4H), rows = [inp0 batch..., inp1 batch...]
    arranged = proj.transpose(1, 3, 0, 2, 4).reshape(T_, 4, 2 * B, 4 * H)
    rev = arranged[::-1]
    xg = jnp.stack([arranged[:, ld] if ld % 2 == 0 else rev[:, ld] for ld in range(4)],
                   axis=1)
    h_all = _lstm_grouped(xg, lp['w_hh_all'])                  # (T, 4, 2B, H)

    def out_dir(ld, inp):        # forward-time (T, B, H)
        h = h_all[:, ld] if ld % 2 == 0 else h_all[::-1, ld]
        return h[:, inp * B:(inp + 1) * B]

    def bidir(inp, lstm):        # PyTorch bidirectional concat order: [fwd, bwd]
        return jnp.concatenate([out_dir(lstm * 2, inp), out_dir(lstm * 2 + 1, inp)], axis=-1)

    r2r = bidir(0, 0)
    r2i = bidir(0, 1)
    i2r = bidir(1, 0)
    i2i = bidir(1, 1)
    real_out = r2r - i2i
    imag_out = i2r + r2i
    if lp['proj'] is not None:
        M = T_ * B
        F2 = real_out.shape[-1]
        Pw = lp['proj']['W']
        dout = Pw.shape[1] // 2
        P = pallas_matmul(
            jnp.concatenate([real_out.reshape(M, F2), imag_out.reshape(M, F2)], axis=0), Pw)
        real_out = (P[:M, :dout] + lp['proj']['br']).reshape(T_, B, dout)
        imag_out = (P[M:, dout:] + lp['proj']['bi']).reshape(T_, B, dout)
    return real_out, imag_out


# --------------------------- STFT kernels / params --------------------------

def make_stft_kernels():
    n = np.arange(WIN_LEN)
    window = (0.5 - 0.5 * np.cos(2.0 * np.pi * n / WIN_LEN)) ** 0.5  # sqrt(hann), periodic
    fourier_basis = np.fft.rfft(np.eye(FFT_LEN))[:WIN_LEN]           # [400, 257] complex
    kernel = np.concatenate([np.real(fourier_basis), np.imag(fourier_basis)], 1).T  # [514, 400]
    fwd = (kernel * window).astype(np.float32)
    inv = (np.linalg.pinv(kernel).T * window).astype(np.float32)
    return fwd, inv, window.astype(np.float32)


def init_params(key):
    keys = iter(jax.random.split(key, 128))

    def nrm(shape, std=0.05):
        return std * jax.random.normal(next(keys), shape, dtype=jnp.float32)

    def uni(shape, k):
        return jax.random.uniform(next(keys), shape, minval=-k, maxval=k, dtype=jnp.float32)

    def bn_init(c):
        return dict(Wrr=jnp.ones((c,), jnp.float32), Wri=uni((c,), 0.9),
                    Wii=jnp.ones((c,), jnp.float32), Br=jnp.zeros((c,), jnp.float32),
                    Bi=jnp.zeros((c,), jnp.float32))

    params = {'enc': [], 'dec': []}
    for cin, cout in [(2, 16), (16, 32), (32, 64), (64, 128), (128, 256), (256, 256)]:
        ci, co = cin // 2, cout // 2
        conv = dict(wr=nrm((co, ci, 5, 2)), wi=nrm((co, ci, 5, 2)),
                    br=jnp.zeros((co,), jnp.float32), bi=jnp.zeros((co,), jnp.float32))
        params['enc'].append((conv, bn_init(co)))
    dec_ch = [(512, 256), (512, 128), (256, 64), (128, 32), (64, 16), (32, 2)]
    for idx, (cin, cout) in enumerate(dec_ch):
        ci, co = cin // 2, cout // 2
        conv = dict(wr=nrm((ci, co, 5, 2)), wi=nrm((ci, co, 5, 2)),
                    br=jnp.zeros((co,), jnp.float32), bi=jnp.zeros((co,), jnp.float32))
        params['dec'].append((conv, bn_init(co) if idx < 5 else None))

    H = 64  # rnn_units // 2 per real/imag LSTM
    kfac = 1.0 / np.sqrt(H)

    def lstm_dir(D):
        return dict(w_ih=uni((4 * H, D), kfac), w_hh=uni((4 * H, H), kfac),
                    b_ih=uni((4 * H,), kfac), b_hh=uni((4 * H,), kfac))

    def lin(din, dout):
        kl = 1.0 / np.sqrt(din)
        return dict(w=uni((dout, din), kl), b=uni((dout,), kl))

    # TODO(synk): source NavieComplexLSTM sizing (input_size=rnn_units for layer 1)
    # is taken at the actual 128-dim bidirectional output so the graph is runnable.
    params['rnn'] = [
        dict(real=(lstm_dir(512), lstm_dir(512)), imag=(lstm_dir(512), lstm_dir(512)), proj=None),
        dict(real=(lstm_dir(128), lstm_dir(128)), imag=(lstm_dir(128), lstm_dir(128)),
             proj=dict(r=lin(128, 512), i=lin(128, 512))),
    ]
    return params


def prepare_params(params, stft_fwd, stft_inv, window):
    """Hoist all weight reshuffles (complex weight matrices, flips, stacking,
       bf16 casts) out of the forward hot path."""

    def stack_bn(bn):
        return jnp.stack([bn['Wrr'], bn['Wri'], bn['Wii'], bn['Br'], bn['Bi']], axis=1)

    prep = {'enc': [], 'dec': []}
    for conv, bn in params['enc']:
        W = _complex_weight_matrix(conv['wr'], conv['wi']).astype(jnp.bfloat16)
        bias = jnp.concatenate([conv['br'] - conv['bi'], conv['br'] + conv['bi']])
        prep['enc'].append((dict(W=W, bias=bias), stack_bn(bn)))
    for conv, bn in params['dec']:
        # equivalent forward-conv weights for the transposed conv: flip + swap axes
        wr_c = jnp.flip(conv['wr'], axis=(2, 3)).transpose(1, 0, 2, 3)
        wi_c = jnp.flip(conv['wi'], axis=(2, 3)).transpose(1, 0, 2, 3)
        W = _complex_weight_matrix(wr_c, wi_c).astype(jnp.bfloat16)
        bias = jnp.concatenate([conv['br'] - conv['bi'], conv['br'] + conv['bi']])
        prep['dec'].append((dict(W=W, bias=bias), stack_bn(bn) if bn is not None else None))

    prep['rnn'] = []
    for lp in params['rnn']:
        dirs = []          # ld order: real_fwd, real_bwd, imag_fwd, imag_bwd
        for lstm_name in ('real', 'imag'):
            for d in range(2):
                dirs.append(lp[lstm_name][d])
        H = dirs[0]['w_hh'].shape[1]
        w_ih_all = jnp.concatenate([p['w_ih'].T for p in dirs], axis=1).astype(jnp.bfloat16)
        b_all = jnp.stack([p['b_ih'] + p['b_hh'] for p in dirs], axis=0)      # (4, 4H)
        w_hh_all = jnp.stack([p['w_hh'].T for p in dirs], axis=0)             # (4, H, 4H)
        entry = dict(w_ih_all=w_ih_all, b_all=b_all, w_hh_all=w_hh_all, H=H, proj=None)
        if lp['proj'] is not None:
            pr, pi = lp['proj']['r'], lp['proj']['i']
            entry['proj'] = dict(
                W=jnp.concatenate([pr['w'].T, pi['w'].T], axis=1).astype(jnp.bfloat16),
                br=pr['b'], bi=pi['b'])
        prep['rnn'].append(entry)

    prep['stft_kT'] = jnp.asarray(stft_fwd.T, dtype=jnp.bfloat16)    # (400, 514)
    prep['istft_k'] = jnp.asarray(stft_inv, dtype=jnp.bfloat16)      # (514, 400)
    prep['window'] = window
    return prep


# --------------------------------- forward ----------------------------------

def dccrn_forward(inputs, prep):
    B, L = inputs.shape
    pad = WIN_LEN - WIN_INC
    xpad = jnp.pad(inputs, ((0, 0), (pad, pad)))
    T = (xpad.shape[1] - WIN_LEN) // WIN_INC + 1

    # ---- ConvSTFT ('complex'): gather frames + one framed matmul ----
    frame_idx = np.arange(T)[:, None] * WIN_INC + np.arange(WIN_LEN)[None, :]
    frames = xpad[:, frame_idx]                                        # (B, T, 400)
    specs = pallas_matmul(frames.reshape(B * T, WIN_LEN), prep['stft_kT'])
    specs = specs.reshape(B, T, FFT_LEN + 2).transpose(0, 2, 1)        # [B, 514, T]
    Fh = FFT_LEN // 2 + 1
    spec_real, spec_imag = specs[:, :Fh], specs[:, Fh:]                # [B, 257, T]
    cspecs = jnp.stack([spec_real, spec_imag], axis=1)[:, :, 1:]       # [B, 2, 256, T]

    # ---- encoder ----
    x = cspecs
    enc = []
    for conv_l, bn_p in prep['enc']:
        x = conv_bn_prelu(x, conv_l, bn_p, transposed=False)
        enc.append(x)
    x1, x2, x3, x4, x5, x6 = enc

    # ---- complex LSTM enhancement ----
    Bc, C2, D_, T_ = x6.shape                          # C2=256, D_=4
    out = x6.transpose(3, 0, 1, 2)                     # [T, B, 256, 4]
    r_in = out[:, :, :C2 // 2].reshape(T_, Bc, (C2 // 2) * D_)
    i_in = out[:, :, C2 // 2:].reshape(T_, Bc, (C2 // 2) * D_)
    for lp in prep['rnn']:
        r_in, i_in = navie_complex_lstm(r_in, i_in, lp)
    r_in = r_in.reshape(T_, Bc, C2 // 2, D_)
    i_in = i_in.reshape(T_, Bc, C2 // 2, D_)
    out = jnp.concatenate([r_in, i_in], axis=2).transpose(1, 2, 3, 0)  # [B, 256, 4, T]

    # ---- decoder with complex skip connections ----
    # TODO(synk): source forward does `complex_cat([x, x6], 1)` with x = the
    # pre-encoder spec (shape-incompatible); following original DCCRN we use the
    # post-RNN tensor `out` here.
    d = out
    for (conv_l, bn_p), skip in zip(prep['dec'], [x6, x5, x4, x3, x2, x1]):
        d = complex_cat([d, skip], axis=1)
        d = conv_bn_prelu(d, conv_l, bn_p, transposed=True)
        d = d[..., 1:]

    # ---- mask application (tanh-mag mask + phase rotation) ----
    mask_real = jnp.pad(d[:, 0], ((0, 0), (1, 0), (0, 0)))     # [B, 257, T]
    mask_imag = jnp.pad(d[:, 1], ((0, 0), (1, 0), (0, 0)))
    real, imag = apply_mask(mask_real, mask_imag, spec_real, spec_imag)
    out_spec = jnp.concatenate([real, imag], axis=1)           # [B, 514, T]

    # ---- ConviSTFT: framed matmul + single scatter-add overlap-add ----
    frames_i = pallas_matmul(out_spec.transpose(0, 2, 1).reshape(B * T, FFT_LEN + 2),
                             prep['istft_k'])
    frames_i = frames_i.reshape(B, T, WIN_LEN)
    L_out = (T - 1) * WIN_INC + WIN_LEN
    wav = jnp.zeros((B, L_out), jnp.float32).at[:, frame_idx].add(frames_i)
    coff = np.zeros((L_out,), np.float32)
    np.add.at(coff, frame_idx.reshape(-1), np.tile(prep['window'] ** 2, T))
    wav = wav / (jnp.asarray(coff)[None, :] + 1e-8)
    out_wav = jnp.clip(wav[:, pad:-pad], -1.0, 1.0)[:, None, :]    # [B, 1, L]
    return out_spec, out_wav


if __name__ == "__main__":
    key = jax.random.PRNGKey(0)
    k_in, k_par = jax.random.split(key)
    B, L = 1, 1000   # -> 13 STFT frames (small but consistent with fft_len=512)
    wav_in = 0.1 * jax.random.normal(k_in, (B, L), dtype=jnp.float32)
    params = init_params(k_par)
    stft_fwd, stft_inv, window = make_stft_kernels()
    prep = prepare_params(params, stft_fwd, stft_inv, window)
    out_spec, out_wav = dccrn_forward(wav_in, prep)
    out_spec = jax.block_until_ready(out_spec)
    out_wav = jax.block_until_ready(out_wav)
    assert out_spec.shape == (B, FFT_LEN + 2, 13), out_spec.shape
    assert out_wav.shape == (B, 1, L), out_wav.shape
    assert bool(jnp.isfinite(out_spec).all()) and bool(jnp.isfinite(out_wav).all())
    print("KERNEL_OK")
</pallas_src>

<mosaic_0001>
module attributes {stable_mosaic.version = 11 : i64} {
  func.func @_matmul_kernel(%arg0: i32, %arg1: i32, %arg2: i32, %arg3: memref<16x256xbf16, #tpu.memory_space<vmem>>, %arg4: memref<256x256xbf16, #tpu.memory_space<vmem>>, %arg5: memref<16x256xf32, #tpu.memory_space<vmem>>, %arg6: memref<16x256xf32, #tpu.memory_space<vmem>>) attributes {dimension_semantics = [#tpu.dimension_semantics<parallel>, #tpu.dimension_semantics<parallel>, #tpu.dimension_semantics<arbitrary>], iteration_bounds = array<i64: 1, 3, 2>, scalar_prefetch = 0 : i64, scratch_operands = 1 : i64, tpu.core_type = #tpu.core_type<tc>, window_params = [{transform_indices = @transform_0, window_bounds = array<i64: 16, 256>}, {transform_indices = @transform_1, window_bounds = array<i64: 256, 256>}, {transform_indices = @transform_2, window_bounds = array<i64: 16, 256>}]} {
    %c0_i32 = arith.constant 0 : i32
    %0 = arith.cmpi eq, %arg2, %c0_i32 : i32
    %1 = arith.extui %0 : i1 to i32
    %c0_i32_0 = arith.constant 0 : i32
    %2 = arith.cmpi ne, %1, %c0_i32_0 : i32
    scf.if %2 {
      %cst_9 = arith.constant 0.000000e+00 : f32
      %12 = vector.broadcast %cst_9 : f32 to vector<16x256xf32>
      %c0_10 = arith.constant 0 : index
      %c0_11 = arith.constant 0 : index
      %13 = vector.load %arg6[%c0_10, %c0_11] : memref<16x256xf32, #tpu.memory_space<vmem>>, vector<16x256xf32>
      tpu.vector_store %arg6[%c0_10, %c0_11], %12 {strides = array<i32>} : memref<16x256xf32, #tpu.memory_space<vmem>>, vector<16x256xf32>,
    } else {
    }
    %c0 = arith.constant 0 : index
    %c0_1 = arith.constant 0 : index
    %3 = vector.load %arg6[%c0, %c0_1] : memref<16x256xf32, #tpu.memory_space<vmem>>, vector<16x256xf32>
    %c0_2 = arith.constant 0 : index
    %c0_3 = arith.constant 0 : index
    %4 = vector.load %arg3[%c0_2, %c0_3] : memref<16x256xbf16, #tpu.memory_space<vmem>>, vector<16x256xbf16>
    %c0_4 = arith.constant 0 : index
    %c0_5 = arith.constant 0 : index
    %5 = vector.load %arg4[%c0_4, %c0_5] : memref<256x256xbf16, #tpu.memory_space<vmem>>, vector<256x256xbf16>
    %cst = arith.constant dense<0.000000e+00> : vector<16x256xf32>
    %6 = tpu.matmul %4, %5, %cst {dimension_numbers = #tpu.dot_dimension_numbers<[1], [0], [0], [1], [0, 0, 1, 1], [], []>} : vector<16x256xbf16>, vector<256x256xbf16>, vector<16x256xf32> -> vector<16x256xf32>
    %7 = arith.addf %3, %6 : vector<16x256xf32>
    %c0_6 = arith.constant 0 : index
    %c0_7 = arith.constant 0 : index
    %8 = vector.load %arg6[%c0_6, %c0_7] : memref<16x256xf32, #tpu.memory_space<vmem>>, vector<16x256xf32>
    tpu.vector_store %arg6[%c0_6, %c0_7], %7 {strides = array<i32>} : memref<16x256xf32, #tpu.memory_space<vmem>>, vector<16x256xf32>,
    %c1_i32 = arith.constant 1 : i32
    %9 = arith.cmpi eq, %arg2, %c1_i32 : i32
    %10 = arith.extui %9 : i1 to i32
    %c0_i32_8 = arith.constant 0 : i32
    %11 = arith.cmpi ne, %10, %c0_i32_8 : i32
    scf.if %11 {
      %c0_9 = arith.constant 0 : index
      %c0_10 = arith.constant 0 : index
      %12 = vector.load %arg6[%c0_9, %c0_10] : memref<16x256xf32, #tpu.memory_space<vmem>>, vector<16x256xf32>
      %c0_11 = arith.constant 0 : index
      %c0_12 = arith.constant 0 : index
      %13 = vector.load %arg5[%c0_11, %c0_12] : memref<16x256xf32, #tpu.memory_space<vmem>>, vector<16x256xf32>
      tpu.vector_store %arg5[%c0_11, %c0_12], %12 {strides = array<i32>} : memref<16x256xf32, #tpu.memory_space<vmem>>, vector<16x256xf32>,
    } else {
    }
    return
  }
  func.func @transform_0(%arg0: i32, %arg1: i32, %arg2: i32) -> (i32, i32) {
    %c0_i32 = arith.constant 0 : i32
    return %arg0, %arg2 : i32, i32
  }
  func.func @transform_1(%arg0: i32, %arg1: i32, %arg2: i32) -> (i32, i32) {
    %c0_i32 = arith.constant 0 : i32
    return %arg2, %arg1 : i32, i32
  }
  func.func @transform_2(%arg0: i32, %arg1: i32, %arg2: i32) -> (i32, i32) {
    %c0_i32 = arith.constant 0 : i32
    return %arg0, %arg1 : i32, i32
  }
}

</mosaic_0001>

<bundles_post_ra>
// kernel: tpu_custom_call.1
= control target key start
LH: loop header
LB: loop body
LE: loop exit
PB: predicated region body
PF: predicated region fallthrough
CT: control target
= control target key end

     0   :  { %s1554_s0 = inlined_call_operand.hbm [shape: bf16[16,512], index: 0, kind: input, shape index: {}]   ;;  %s1555_s1 = inlined_call_operand.hbm [shape: bf16[512,768], index: 1, kind: input, shape index: {}]   ;;  %s1556_s2 = inlined_call_operand.hbm [shape: f32[16,768], index: 2, kind: output, shape index: {}]  }
   0x1   :  { %1569 = sst [smem:[#allocation17_spill]] %s1554_s0 }
   0x2   :  { %1570 = sst [smem:[#allocation18_spill]] %s1556_s2 }
   0x3   :  { %7 = vsyncpa [#allocation4], 0 }
   0x4   :  { %9 = vsyncpa [#allocation4 + $0x1], 0 }
   0x5   :  { %10 = vsyncpa [#allocation7], 0 }
   0x6   :  { %12 = vsyncpa [#allocation7 + $0x1], 0 }
   0x7   :  { %13 = vsyncpa [#allocation5], 0 }
   0x8   :  { %15 = vsyncpa [#allocation5 + $0x1], 0  ;;  %s1142_s9 = smov 0   ;;  %s1144_s10 = smov 0  }
   0x9   :  { %s1146_s11 = smov 0   ;;  %s1148_s12 = smov 0  }
   0xa   :  { %s1150_s13 = smov 0   ;;  %s1152_s14 = smov 0  }
   0xb   :  { %s1154_s15 = smov 0   ;;  %s1156_s16 = smov 0  }
   0xc   :  { %s1158_s17 = smov 0   ;;  %s1160_s18 = smov 0  }
   0xd   :  { %s1162_s19 = smov 0   ;;  %s1164_s20 = smov 0  }
   0xe   :  { %s1166_s21 = smov 0   ;;  %s1168_s22 = smov 0  }
   0xf LB: > { %1571 = sst [smem:[#allocation12_spill]] %s1094_s17  ;;  %s654_s23 = sadd.s32 4294967295, %s1114_s22   ;;  %s1114_s22 = sphi %s1168_s22, %s21_s22   ;;  %s1110_s21 = sphi %s1166_s21, %s1618_s21   ;;  %s1106_s20 = sphi %s1164_s20, %s1617_s20   ;;  %s1102_s19 = sphi %s1162_s19, %s1616_s19   ;;  %s1098_s18 = sphi %s1160_s18, %s1615_s18   ;;  %s1094_s17 = sphi %s1158_s17, %s1603_s17   ;;  %s1090_s16 = sphi %s1156_s16, %s1614_s16   ;;  %s1086_s15 = sphi %s1154_s15, %s1613_s15   ;;  %s1082_s14 = sphi %s1152_s14, %s1612_s14   ;;  %s1078_s13 = sphi %s1150_s13, %s1611_s13   ;;  %s1074_s12 = sphi %s1148_s12, %s1610_s12   ;;  %s1070_s11 = sphi %s1146_s11, %s1609_s11   ;;  %s1066_s10 = sphi %s1144_s10, %s1608_s10   ;;  %s1062_s9 = sphi %s1142_s9, %s1607_s9  }
  0x10   : > { %s33_s24 = sadd.s32 1, %s1106_s20  ;;  %s49_s26 = sadd.s32 1, %s1094_s17 }
  0x11   : > { %p1212_p0 = scmp.ge.s32.totalorder %s33_s24, 2  ;;  %p56_p1 = scmp.ne.s32.totalorder %s1094_s17, %s1090_s16 }
  0x12   : > { %p1560_p2 = scmp.eq.s32.totalorder %s1114_s22, 0  ;;  %p62_p4 = scmp.ne.s32.totalorder %s1090_s16, %s1086_s15 }
  0x13   : > { %s1620_s24 = smov (%p1212_p0, %s33_s24), 0  ;;  %p1235_p5 = scmp.eq.s32.totalorder %s654_s23, 0 }
  0x14   : > { %1573 = sst [smem:[#allocation13_spill]] %s1620_s24  ;;  %p1226_p3 = por %p1560_p2, %p56_p1 }
  0x15   : > { %s1233_s28 = ssub.s32 %s1106_s20, %s1620_s24  ;;  %p1240_p7 = scmp.eq.s32.totalorder %s654_s23, 5 }
  0x16   : > { %s1575_s29 = scalar_select %p1235_p5, 1, 0 }
  0x17   : > { %p47_p6 = scmp.eq.s32.totalorder %s1233_s28, 0  ;;  %p1246_p8 = por %p1235_p5, %p62_p4 }
  0x18   : > { %s1576_s30 = scalar_select %p1240_p7, 1, 0 }
  0x19   : > { %s1577_s3 = scalar_select %p1246_p8, 1, 0 }
  0x1a   : > { %s1251_s4 = scalar_select %p47_p6, %s1094_s17, %s49_s26  }
  0x1b   : > { %p1559_p9 = scmp.lt.s32.totalorder %s1114_s22, 6  ;;  %s142_s5 = sand.u32 1, %s1094_s17  }
  0x1c   : > { %1578 = sst [smem:[#allocation14_spill]] %s1251_s4  ;;  %s658_s6 = sshll.u32 %s142_s5, 4 }
  0x1d   : > { %s711_s7 = sshll.u32 %s1106_s20, 7  ;;  %s1579_s0 = sld [smem:[#allocation17_spill]] }
  0x1e   : > { %s146_s23 = scalar_lea.vmem [#allocation3], %s658_s6  ;;  %p1267_p10 = pnand %p1559_p9, %p1226_p3 }
  0x1f   : > { %s156_s2 = sshll.u32 %s146_s23, 4  ;;  %s1271_s4 = scalar_lea.sflag [#allocation4], %s142_s5  ;;  %s1261_s2 = int_to_ptr.vmem [resolvable:$true] %s156_s2 }
  0x20   : > { %p906_p12 = pneg %p1267_p10 }
  0x23   : > { %s1259_s24 = scalar_lea.hbm %s1579_s0, %s711_s7  ;;  %s909_s27 = scalar_lea.hbm %s1579_s0, 512 }
  0x24   : > { %s904_s7 = scalar_lea.hbm %s1259_s24, 256  ;;  %p910_p3 = scmp.lt.u32.totalorder %s1259_s24, %s1579_s0 }
  0x25   : > { %p905_p11 = scmp.ne.s32.totalorder %s1259_s24, %s904_s7  ;;  %p911_p4 = scmp.lt.u32.totalorder %s909_s27, %s904_s7 }
  0x26   : > { %p913_p9 = scmp.lt.u32.totalorder %s904_s7, %s1259_s24 }
  0x27   : > { %p907_p13 = pnand %p906_p12, %p905_p11  ;;  %p912_p6 = por %p911_p4, %p910_p3 }
  0x29   : > { %p908_p1 = pneg %p907_p13  ;;  %p914_p2 = por %p913_p9, %p912_p6 }
  0x2b   : > { %p915_p8 = pnand %p914_p2, %p908_p1 }
  0x2d   : > { %918 = shalt.err (!%p915_p8)
}
  0x2e   : > { %s919_s5 = scalar_lea.vmem %s1261_s2, 256  ;;  %s1116_s6 = smov [#allocation3]  }
  0x2f   : > { %p920_p11 = scmp.ne.s32.totalorder %s1261_s2, %s919_s5  ;;  %s924_s8 = sshll.u32 %s1116_s6, 4  ;;  %s925_s8 = int_to_ptr.vmem [resolvable:$false] %s924_s8 }
  0x30   : > { %s926_s15 = scalar_lea.vmem %s925_s8, 512  ;;  %p927_p5 = scmp.lt.s32.totalorder %s1261_s2, %s925_s8 }
  0x31   : > { %p922_p13 = pnand %p920_p11, %p906_p12  ;;  %p928_p3 = scmp.lt.s32.totalorder %s926_s15, %s919_s5 }
  0x33   : > { %p923_p7 = pneg %p922_p13  ;;  %p929_p4 = por %p928_p3, %p927_p5 }
  0x35   : > { %p930_p9 = pnand %p929_p4, %p923_p7 }
  0x37   : > { %933 = shalt.err (!%p930_p9)
}
  0x38   : > { %s1117_s7 = smov 256   ;;  %s1563_s27 = smov 128  }
  0x39   : > { %s1564_s23 = smov 8   ;;  %p666_p2 = scmp.ge.s32.totalorder %s1114_s22, 1 }
  0x3a   : > { %723 = dma.hbm_to_vmem [thread:$0]  (!%p1267_p10), %s1259_s24, 256, %s1261_s2, %s1271_s4, %s1117_s7, %s1563_s27, %s1564_s23  }
  0x3b   : > { %p188_p5 = scmp.lt.s32.totalorder %s1114_s22, 7  ;;  %s655_s6 = sadd.s32 4294967294, %s1114_s22  }
  0x3c   : > { %s36_s8 = sadd.s32 1, %s1110_s21  ;;  %s77_s15 = sadd.s32 1, %s1082_s14 }
  0x3d   : > { %p1303_p7 = pnand %p666_p2, %p188_p5  ;;  %s1622_s8 = smov (!%p1212_p0, %s36_s8), %s1110_s21 }
  0x3e   : > { %p84_p8 = scmp.ne.s32.totalorder %s1082_s14, %s1078_s13  ;;  %p90_p10 = scmp.ne.s32.totalorder %s1078_s13, %s1074_s12 }
  0x3f   : > { %p38_p12 = scmp.ge.s32.totalorder %s1622_s8, 3  ;;  %s105_s2 = sadd.s32 1, %s1070_s11 }
  0x40   : > { %p1582_p1 = scmp.eq.s32.totalorder %s1114_s22, 0  ;;  %p1584_p11 = scmp.ne.s32.totalorder %s1575_s29, 0 }
  0x41   : > { %s1624_s8 = smov (%p38_p12, %s1622_s8), 0  ;;  %p115_p0 = scmp.ne.s32.totalorder %s1070_s11, %s1066_s10 }
  0x42   : > { %p1320_p6 = por %p84_p8, %p1582_p1  ;;  %p1326_p13 = por %p90_p10, %p1584_p11 }
  0x43   : > { %1586 = sst [smem:[#allocation15_spill]] %s1624_s8  ;;  %p121_p3 = scmp.ne.s32.totalorder %s1066_s10, %s1062_s9 }
  0x44   : > { %s1585_s4 = scalar_select %p1326_p13, 1, 0 }
  0x45   : > { %s73_s12 = ssub.s32 %s1110_s21, %s1624_s8  ;;  %p122_p4 = scmp.eq.s32.totalorder %s655_s6, 5 }
  0x46   : > { %s74_s25 = sor.u32 %s73_s12, %s1233_s28  ;;  %p103_p9 = scmp.eq.s32.totalorder %s73_s12, 0 }
  0x47   : > { %p75_p2 = scmp.eq.s32.totalorder %s74_s25, 0  ;;  %p1587_p5 = scmp.ne.s32.totalorder %s1576_s30, 0 }
  0x48   : > { %s1346_s26 = scalar_select %p103_p9, %s1070_s11, %s105_s2  }
  0x49   : > { %p1341_p8 = por %p1587_p5, %p115_p0  ;;  %p1351_p10 = por %p122_p4, %p121_p3 }
  0x4a   : > { %s1349_s7 = scalar_select %p75_p2, %s1082_s14, %s77_s15  }
  0x4b   : > { %s1588_s29 = scalar_select %p1341_p8, 1, 0 }
  0x4c   : > { %1589 = sst [smem:[#allocation16_spill]] %s1349_s7  ;;  %s166_s23 = sand.u32 1, %s1082_s14  }
  0x4d   : > { %s1590_s27 = scalar_select %p1351_p10, 1, 0 }
  0x4e   : > { %s661_s0 = sshll.u32 %s166_s23, 8  ;;  %s663_s8 = sshll.u32 %s1110_s21, 1 }
  0x4f   : > { %s713_s6 = smul.u32 192, %s1106_s20  ;;  %s170_s28 = scalar_lea.vmem [#allocation6], %s661_s0 }
  0x50   : > { %s180_s12 = sshll.u32 %s170_s28, 4  ;;  %p1591_p12 = scmp.lt.s32.totalorder %s1114_s22, 6  ;;  %s1358_s12 = int_to_ptr.vmem [resolvable:$true] %s180_s12 }
  0x51   : > { %s177_s15 = sadd.s32 %s713_s6, %s663_s8  ;;  %s1373_s0 = scalar_lea.sflag [#allocation7], %s166_s23 }
  0x52   : > { %p1364_p1 = pnand %p1591_p12, %p1320_p6  ;;  %s665_s2 = sshll.u32 %s177_s15, 6 }
  0x53   : > { %s1371_s7 = scalar_lea.hbm %s1555_s1, %s665_s2  ;;  %s939_s17 = scalar_lea.hbm %s1555_s1, 24576 }
  0x54   : > { %s934_s24 = scalar_lea.hbm %s1371_s7, 4096  ;;  %p936_p11 = pneg %p1364_p1 }
  0x55   : > { %p935_p6 = scmp.ne.s32.totalorder %s1371_s7, %s934_s24  ;;  %p940_p4 = scmp.lt.u32.totalorder %s1371_s7, %s1555_s1 }
  0x56   : > { %p941_p9 = scmp.lt.u32.totalorder %s939_s17, %s934_s24  ;;  %p943_p5 = scmp.lt.u32.totalorder %s934_s24, %s1371_s7 }
  0x57   : > { %p937_p0 = pnand %p936_p11, %p935_p6 }
  0x58   : > { %p942_p2 = por %p941_p9, %p940_p4 }
  0x59   : > { %p938_p3 = pneg %p937_p0 }
  0x5a   : > { %p944_p12 = por %p943_p5, %p942_p2 }
  0x5c   : > { %p945_p10 = pnand %p944_p12, %p938_p3 }
  0x5e   : > { %948 = shalt.err (!%p945_p10)
}
  0x5f   : > { %s949_s23 = scalar_lea.vmem %s1358_s12, 4096  ;;  %s1120_s2 = smov [#allocation6]  }
  0x60   : > { %p950_p6 = scmp.ne.s32.totalorder %s1358_s12, %s949_s23  ;;  %s954_s25 = sshll.u32 %s1120_s2, 4  ;;  %s955_s25 = int_to_ptr.vmem [resolvable:$false] %s954_s25 }
  0x61   : > { %s956_s8 = scalar_lea.vmem %s955_s25, 8192  ;;  %p957_p13 = scmp.lt.s32.totalorder %s1358_s12, %s955_s25 }
  0x62   : > { %p952_p0 = pnand %p950_p6, %p936_p11  ;;  %p958_p4 = scmp.lt.s32.totalorder %s956_s8, %s949_s23 }
  0x64   : > { %p953_p8 = pneg %p952_p0  ;;  %p959_p9 = por %p958_p4, %p957_p13 }
  0x66   : > { %p960_p2 = pnand %p959_p9, %p953_p8 }
  0x68   : > { %963 = shalt.err (!%p960_p2)
}
  0x69   : > { %s1121_s24 = smov 384   ;;  %s1593_s6 = smov 8  }
  0x6a   : > { %s1594_s17 = smov 128   ;;  %192 = sbr.rel (%p1303_p7) target bundleno = 446 (0x1be), region = 28 }
  0x6b   : > { %726 = dma.hbm_to_vmem [thread:$0]  (!%p1364_p1), %s1371_s7, 4096, %s1358_s12, %s1373_s0, %s1121_s24, %s1594_s17, %s1593_s6  }
  0x6c   : > { %s194_s28 = sand.u32 (!%p1303_p7), 1, %s1090_s16   ;;  %p1595_p13 = scmp.ne.s32.totalorder (!%p1303_p7), %s1577_s3, 0 }
  0x6d   : > { %s1406_s15 = sshll.u32 (!%p1303_p7), %s194_s28, 4  ;;  %s195_s23 = scalar_lea.sflag (!%p1303_p7), [#allocation4], %s194_s28 }
  0x6e   : > { %s198_s2 = scalar_lea.vmem (!%p1303_p7), [#allocation3], %s1406_s15 }
  0x71   : > { %1049 = dma.done.wait (%p1595_p13), %s195_s23, 256  }
  0x72   : > { %1051 = vsyncadd (%p1595_p13), %s195_s23, 4294967040  ;;  %s203_s30 = sand.u32 1, %s1078_s13   ;;  %p1596_p7 = scmp.ne.s32.totalorder %s1585_s4, 0 }
  0x73   : > { %s668_s7 = sshll.u32 %s203_s30, 8  ;;  %s204_s12 = scalar_lea.sflag [#allocation7], %s203_s30 }
  0x74   : > { %s1414_s5 = scalar_lea.vmem [#allocation6], %s668_s7 }
  0x75   : > { %1053 = dma.done.wait (%p1596_p7), %s204_s12, 4096  }
  0x76   : > { %1055 = vsyncadd (%p1596_p7), %s204_s12, 4294963200  ;;  %s230_s0 = sand.u32 1, %s1066_s10   ;;  %p670_p8 = scmp.ne.s32.totalorder %s1098_s18, 0 }
  0x77   : > { %s669_s25 = sshll.u32 %s230_s0, 5  ;;  %v1122_v0 = vmov (!%p670_p8), 0.0  }
  0x78   : > { %s1423_s8 = scalar_lea.vmem [#allocation8], %s669_s25  ;;  %242 = sbr.rel (%p670_p8) target bundleno = 127 (0x7f), region = 40  ;;  %243 = vst [vmem:[#allocation2] sm:$0xff] (!%p670_p8), %v1122_v0  ;;  %244 = vst [vmem:[#allocation2 + $0x8] sm:$0xff] (!%p670_p8), %v1122_v0 }
  0x79   : > { %245 = vst [vmem:[#allocation2 + $0x10] sm:$0xff] (!%p670_p8), %v1122_v0  ;;  %246 = vst [vmem:[#allocation2 + $0x18] sm:$0xff] (!%p670_p8), %v1122_v0 }
  0x7f PF: > { %v853_v1 = vld [vmem:[%s1414_s5 + $0x4] ss:$8 sps:$4 sm:$0xff]   ;;  %v855_v2 = vld [vmem:[%s1414_s5] ss:$8 sps:$4 sm:$0xff]   ;;  %v856_v3 = vld [vmem:[%s1414_s5 + $0x14] ss:$8 sps:$4 sm:$0xff]  }
  0x80   : > { %455 = vmatprep.subr.bf16.mxu0 %v853_v1  ;;  %v858_v4 = vld [vmem:[%s1414_s5 + $0x10] ss:$8 sps:$4 sm:$0xff]   ;;  %v859_v5 = vld [vmem:[%s1414_s5 + $0x24] ss:$8 sps:$4 sm:$0xff]   ;;  %v861_v6 = vld [vmem:[%s1414_s5 + $0x20] ss:$8 sps:$4 sm:$0xff]  }
  0x81   : > { %456 = vmatpush1.bf16.msra.mxu0 %v855_v2  ;;  %v862_v7 = vld [vmem:[%s1414_s5 + $0x34] ss:$8 sps:$4 sm:$0xff]   ;;  %v864_v8 = vld [vmem:[%s1414_s5 + $0x30] ss:$8 sps:$4 sm:$0xff]   ;;  %v865_v9 = vld [vmem:[%s1414_s5 + $0x44] ss:$8 sps:$4 sm:$0xff]  }
  0x82   : > { %457 = vmatprep.subr.bf16.mxu0 %v856_v3  ;;  %v867_v10 = vld [vmem:[%s1414_s5 + $0x40] ss:$8 sps:$4 sm:$0xff]   ;;  %v868_v11 = vld [vmem:[%s1414_s5 + $0x54] ss:$8 sps:$4 sm:$0xff]   ;;  %v870_v12 = vld [vmem:[%s1414_s5 + $0x50] ss:$8 sps:$4 sm:$0xff]  }
  0x83   : > { %v871_v13 = vld [vmem:[%s1414_s5 + $0x64] ss:$8 sps:$4 sm:$0xff]   ;;  %v873_v15 = vld [vmem:[%s1414_s5 + $0x60] ss:$8 sps:$4 sm:$0xff]   ;;  %v874_v16 = vld [vmem:[%s1414_s5 + $0x74] ss:$8 sps:$4 sm:$0xff]  }
  0x84   : > { %v903_v14 = vld [vmem:[%s198_s2 + $0x4] ss:$8 sps:$4 sm:$0xff]   ;;  %v876_v17 = vld [vmem:[%s1414_s5 + $0x70] ss:$8 sps:$4 sm:$0xff]   ;;  %v879_v19 = vld [vmem:[%s1414_s5 + $0x80] ss:$8 sps:$4 sm:$0xff]  }
  0x85   : > { %458 = vmatpush1.bf16.msra.mxu0 %v858_v4  ;;  %487 = vmatprep.mubr.bf16.mxu0 %v903_v14  ;;  %v877_v18 = vld [vmem:[%s1414_s5 + $0x84] ss:$8 sps:$4 sm:$0xff]   ;;  %v880_v20 = vld [vmem:[%s1414_s5 + $0x94] ss:$8 sps:$4 sm:$0xff]   ;;  %v882_v21 = vld [vmem:[%s1414_s5 + $0x90] ss:$8 sps:$4 sm:$0xff]  }
  0x86   : > { %459 = vmatprep.subr.bf16.mxu0 %v859_v5  ;;  %v883_v22 = vld [vmem:[%s1414_s5 + $0xa4] ss:$8 sps:$4 sm:$0xff]   ;;  %v885_v23 = vld [vmem:[%s1414_s5 + $0xa0] ss:$8 sps:$4 sm:$0xff]   ;;  %v886_v24 = vld [vmem:[%s1414_s5 + $0xb4] ss:$8 sps:$4 sm:$0xff]  }
  0x87   : > { %v888_v25 = vld [vmem:[%s1414_s5 + $0xb0] ss:$8 sps:$4 sm:$0xff]   ;;  %v889_v26 = vld [vmem:[%s1414_s5 + $0xc4] ss:$8 sps:$4 sm:$0xff]   ;;  %v891_v27 = vld [vmem:[%s1414_s5 + $0xc0] ss:$8 sps:$4 sm:$0xff]  }
  0x88   : > { %v892_v28 = vld [vmem:[%s1414_s5 + $0xd4] ss:$8 sps:$4 sm:$0xff]   ;;  %v894_v29 = vld [vmem:[%s1414_s5 + $0xd0] ss:$8 sps:$4 sm:$0xff]   ;;  %v895_v30 = vld [vmem:[%s1414_s5 + $0xe4] ss:$8 sps:$4 sm:$0xff]  }
  0x89   : > { %460 = vmatpush1.bf16.msra.mxu0 %v861_v6  ;;  %v897_v31 = vld [vmem:[%s1414_s5 + $0xe0] ss:$8 sps:$4 sm:$0xff]   ;;  %v898_v32 = vld [vmem:[%s1414_s5 + $0xf4] ss:$8 sps:$4 sm:$0xff]   ;;  %v900_v33 = vld [vmem:[%s1414_s5 + $0xf0] ss:$8 sps:$4 sm:$0xff]  }
  0x8a   : > { %461 = vmatprep.subr.bf16.mxu0 %v862_v7  ;;  %v901_v34 = vld [vmem:[%s198_s2] ss:$8 sps:$4 sm:$0xff]   ;;  %p705_p10 = scmp.ne.s32.totalorder %s1098_s18, 1 }
  0x8b   : > { %v247_v35 = vld [vmem:[#allocation2] sm:$0xff]  ;;  %v248_v36 = vld [vmem:[#allocation2 + $0x8] sm:$0xff]  ;;  %v249_v38 = vld [vmem:[#allocation2 + $0x10] sm:$0xff] }
  0x8c   : > { %v250_v41 = vld [vmem:[#allocation2 + $0x18] sm:$0xff] }
  0x8d   : > { %462 = vmatpush1.bf16.msra.mxu0 %v864_v8 }
  0x8e   : > { %463 = vmatprep.subr.bf16.mxu0 %v865_v9 }
  0x91   : > { %464 = vmatpush1.bf16.msra.mxu0 %v867_v10 }
  0x92   : > { %465 = vmatprep.subr.bf16.mxu0 %v868_v11 }
  0x95   : > { %466 = vmatpush1.bf16.msra.mxu0 %v870_v12 }
  0x96   : > { %467 = vmatprep.subr.bf16.mxu0 %v871_v13 }
  0x99   : > { %468 = vmatpush1.bf16.msra.mxu0 %v873_v15 }
  0x9a   : > { %469 = vmatprep.subr.bf16.mxu0 %v874_v16 }
  0x9d   : > { %470 = vmatpush1.bf16.msra.mxu0 %v876_v17 }
  0x9e   : > { %471 = vmatprep.subr.bf16.mxu0 %v877_v18 }
  0xa1   : > { %472 = vmatpush1.bf16.msra.mxu0 %v879_v19 }
  0xa2   : > { %473 = vmatprep.subr.bf16.mxu0 %v880_v20 }
  0xa5   : > { %474 = vmatpush1.bf16.msra.mxu0 %v882_v21 }
  0xa6   : > { %475 = vmatprep.subr.bf16.mxu0 %v883_v22 }
  0xa9   : > { %476 = vmatpush1.bf16.msra.mxu0 %v885_v23 }
  0xaa   : > { %477 = vmatprep.subr.bf16.mxu0 %v886_v24 }
  0xad   : > { %478 = vmatpush1.bf16.msra.mxu0 %v888_v25 }
  0xae   : > { %479 = vmatprep.subr.bf16.mxu0 %v889_v26 }
  0xb1   : > { %480 = vmatpush1.bf16.msra.mxu0 %v891_v27 }
  0xb2   : > { %481 = vmatprep.subr.bf16.mxu0 %v892_v28 }
  0xb5   : > { %482 = vmatpush1.bf16.msra.mxu0 %v894_v29 }
  0xb6   : > { %483 = vmatprep.subr.bf16.mxu0 %v895_v30 }
  0xb9   : > { %484 = vmatpush1.bf16.msra.mxu0 %v897_v31 }
  0xba   : > { %485 = vmatprep.subr.bf16.mxu0 %v898_v32 }
  0xbd   : > { %486 = vmatpush1.bf16.msra.mxu0 %v900_v33 }
  0xc0   : > { %488 = vmatmul.mubr.bf16.vlgmr.msra.gmra.mrb[0].mxu0 %v901_v34 }
 0x193   : > { %v489_v37 = vpop.f32.mrb[0].mxu0  ;;  %509 = sbr.rel (%p705_p10) target bundleno = 418 (0x1a2), region = 44 }
 0x194   : > { %v498_v39 = vadd.f32 %v489_v37, %v247_v35  ;;  %v491_v40 = vpop.f32.mrb[1].mxu0 }
 0x195   : > { %v499_v42 = vadd.f32 %v491_v40, %v248_v36  ;;  %v493_v43 = vpop.f32.mrb[2].mxu0 }
 0x196   : > { %502 = vst [vmem:[#allocation2] sm:$0xff] %v498_v39  ;;  %v500_v44 = vadd.f32 %v493_v43, %v249_v38  ;;  %v495_v45 = vpop.f32.mrb[3].mxu0 }
 0x197   : > { %503 = vst [vmem:[#allocation2 + $0x8] sm:$0xff] %v499_v42  ;;  %v501_v46 = vadd.f32 %v495_v45, %v250_v41 }
 0x198   : > { %504 = vst [vmem:[#allocation2 + $0x10] sm:$0xff] %v500_v44 }
 0x199   : > { %505 = vst [vmem:[#allocation2 + $0x18] sm:$0xff] %v501_v46 }
 0x19d   : > { %v510_v47 = vld [vmem:[#allocation2] sm:$0xff] }
 0x19e   : > { %v511_v48 = vld [vmem:[#allocation2 + $0x8] sm:$0xff]  ;;  %514 = vst [vmem:[%s1423_s8] sm:$0xff] %v510_v47 }
 0x19f   : > { %v512_v49 = vld [vmem:[#allocation2 + $0x10] sm:$0xff]  ;;  %515 = vst [vmem:[%s1423_s8 + $0x8] sm:$0xff] %v511_v48 }
 0x1a0   : > { %516 = vst [vmem:[%s1423_s8 + $0x10] sm:$0xff] %v512_v49  ;;  %v513_v50 = vld [vmem:[#allocation2 + $0x18] sm:$0xff] }
 0x1a1   : > { %517 = vst [vmem:[%s1423_s8 + $0x18] sm:$0xff] %v513_v50 }
 0x1a2 PF: > { %s712_s3 = sshll.u32 %s1102_s19, 8  ;;  %s1597_s24 = sld [smem:[#allocation18_spill]] }
 0x1a3   : > { %s535_s17 = sshll.u32 %s1423_s8, 4  ;;  %s1478_s28 = scalar_lea.sflag [#allocation5], %s230_s0  ;;  %s1474_s17 = int_to_ptr.vmem [resolvable:$true] %s535_s17 }
 0x1a4   : > { %s964_s15 = scalar_lea.vmem %s1474_s17, 512  ;;  %p1598_p11 = scmp.ne.s32.totalorder %s1588_s29, 0 }
 0x1a5   : > { %p965_p1 = scmp.ne.s32.totalorder %s1474_s17, %s964_s15  ;;  %s1123_s19 = smov [#allocation8]  }
 0x1a6   : > { %s968_s23 = sshll.u32 %s1123_s19, 4  ;;  %s969_s23 = int_to_ptr.vmem [resolvable:$false] %s968_s23 }
 0x1a7   : > { %p966_p3 = pnand %p965_p1, %p1598_p11  ;;  %s970_s2 = scalar_lea.vmem %s969_s23, 1024 }
 0x1a8   : > { %s1471_s6 = scalar_lea.hbm %s1597_s24, %s712_s3  ;;  %p971_p12 = scmp.lt.s32.totalorder %s1474_s17, %s969_s23 }
 0x1a9   : > { %p967_p5 = pneg %p966_p3  ;;  %p972_p6 = scmp.lt.s32.totalorder %s970_s2, %s964_s15 }
 0x1ab   : > { %p973_p0 = por %p972_p6, %p971_p12 }
 0x1ad   : > { %p974_p4 = pnand %p973_p0, %p967_p5 }
 0x1af   : > { %977 = shalt.err (!%p974_p4)
}
 0x1b0   : > { %s978_s30 = scalar_lea.hbm %s1471_s6, 512  ;;  %s982_s5 = scalar_lea.hbm %s1597_s24, 1536 }
 0x1b1   : > { %p979_p9 = scmp.ne.s32.totalorder %s1471_s6, %s978_s30  ;;  %p983_p7 = scmp.lt.u32.totalorder %s1471_s6, %s1597_s24 }
 0x1b2   : > { %p984_p8 = scmp.lt.u32.totalorder %s982_s5, %s978_s30  ;;  %p986_p1 = scmp.lt.u32.totalorder %s978_s30, %s1471_s6 }
 0x1b3   : > { %p980_p2 = pnand %p979_p9, %p1598_p11 }
 0x1b4   : > { %p985_p10 = por %p984_p8, %p983_p7 }
 0x1b5   : > { %p981_p13 = pneg %p980_p2 }
 0x1b6   : > { %p987_p3 = por %p986_p1, %p985_p10 }
 0x1b8   : > { %p988_p5 = pnand %p987_p3, %p981_p13 }
 0x1ba   : > { %991 = shalt.err (!%p988_p5)
}
 0x1bb   : > { %s1124_s8 = smov 256   ;;  %s1125_s3 = smov 768  }
 0x1bc   : > { %s1126_s18 = smov 16  }
 0x1bd   : > { %718 = dma.vmem_to_hbm [thread:$0]  (%p1598_p11), %s1474_s17, 512, %s1471_s6, %s1478_s28, %s1124_s8, %s1125_s3, %s1126_s18  }
 0x1be PF: > { %p732_p12 = scmp.ge.s32.totalorder %s1114_s22, 2  ;;  %s550_s4 = sand.u32 1, %s1062_s9  }
 0x1bf   : > { %p1599_p6 = scmp.ne.s32.totalorder %s1590_s27, 0  ;;  %s551_s15 = scalar_lea.sflag [#allocation5], %s550_s4 }
 0x1c1   : > { %p728_p0 = pnand %p732_p12, %p1599_p6 }
 0x1c3   : > { %1057 = dma.done.wait (!%p728_p0), %s551_s15, 512  }
 0x1c4   : > { %1059 = vsyncadd (!%p728_p0), %s551_s15, 4294966784  ;;  %s21_s22 = sadd.s32 1, %s1114_s22   ;;  %s1601_s29 = sld [smem:[#allocation16_spill]] }
 0x1c5   : > { %p1507_p4 = scmp.ge.s32.totalorder %s21_s22, 8   ;;  %s1602_s6 = sld [smem:[#allocation12_spill]] }
 0x1c6   : > { %s1603_s17 = sld [smem:[#allocation14_spill]]  ;;  %s1604_s27 = sld [smem:[#allocation13_spill]] }
 0x1c7   : > { %s1605_s28 = sld [smem:[#allocation15_spill]]  ;;  %s1607_s9 = smov %s1066_s10 }
 0x1c8   : > { %s1608_s10 = smov %s1070_s11  ;;  %s1609_s11 = smov %s1346_s26 }
 0x1c9   : > { %s1610_s12 = smov %s1078_s13  ;;  %s1611_s13 = smov %s1082_s14 }
 0x1ca   : > { %s1612_s14 = smov %s1601_s29  ;;  %s1613_s15 = smov %s1090_s16 }
 0x1cb   : > { %s1614_s16 = smov %s1602_s6  ;;  %s1615_s18 = smov %s1106_s20 }
 0x1cc   : > { %s1616_s19 = smov %s1110_s21  ;;  %s1617_s20 = smov %s1604_s27 }
 0x1cd   : > { %s1618_s21 = smov %s1605_s28  ;;  %20 = sbr.rel (!%p1507_p4) target bundleno = 15 (0xf), region = 94 }
 0x1d4   :  { %556 = vsyncpa [#allocation4], 1 }
 0x1d5   :  { %558 = vsyncpa [#allocation4 + $0x1], 1 }
 0x1d6   :  { %559 = vsyncpa [#allocation7], 1 }
 0x1d7   :  { %561 = vsyncpa [#allocation7 + $0x1], 1 }
 0x1d8   :  { %562 = vsyncpa [#allocation5], 1 }
 0x1d9   :  { %564 = vsyncpa [#allocation5 + $0x1], 1 }

</bundles_post_ra>
